<compile_context>
chip_gen: v7x
topology: tpu7x:2x2x1
jax: 0.10.0
libtpu: 0.0.40
codegen_flags: <defaults>
</compile_context>

<pallas_src>
import jax
import jax.numpy as jnp
from jax.experimental import pallas as pl
from jax.experimental.pallas import tpu as pltpu

LANE = 128                       # TPU lane width: last block dim is 128-wide.
SMALL_BYTES = 1 * 1024 * 1024    # below this, a single full-array block wins.
MIB = 1024 * 1024


def _round_up(n, m):
    return ((n + m - 1) // m) * m


_VMEM_BYTES_CACHE = [None]


def _tpu_vmem_bytes():
    """Physical VMEM per TensorCore (v5e/v6e: 128 MiB, v7x: 64 MiB)."""
    if _VMEM_BYTES_CACHE[0] is None:
        try:
            _VMEM_BYTES_CACHE[0] = int(pltpu.get_tpu_info().vmem_capacity_bytes)
        except Exception:
            _VMEM_BYTES_CACHE[0] = 64 * MIB  # conservative (v7x) fallback
    return _VMEM_BYTES_CACHE[0]


def _vmem_limit_bytes():
    # Never ask for all of physical VMEM (v7x has only 64 MiB); leave headroom
    # for compiler-internal scratch and the auto double-buffering.
    return min(48 * MIB, _tpu_vmem_bytes() // 2)


def _select_tile_rows(itemsize, rows, sublane):
    """Tile rows so 2x(in) + 2x(out) double buffers stay well inside VMEM."""
    vmem = _tpu_vmem_bytes()
    total_budget = min(vmem // 4, 24 * MIB)   # all four pipeline buffers
    per_buffer = total_budget // 4            # 2 in-bufs + 2 out-bufs
    tile_rows = per_buffer // (LANE * itemsize)
    tile_rows = max(sublane, (tile_rows // sublane) * sublane)
    # No point tiling past the array; a single-step grid is fine.
    tile_rows = min(tile_rows, _round_up(rows, sublane))
    return tile_rows


def _identity_kernel(x_ref, o_ref):
    # Placeholder for a concrete KGE model's score computation
    # (TransE / DistMult / ConvE ...).  BaseModel defines none -> identity.
    o_ref[...] = x_ref[...]


def _small_passthrough(x):
    """Single full-array VMEM block (exempt from the (8,128) rule); no padding."""
    nbytes = x.size * jnp.dtype(x.dtype).itemsize
    return pl.pallas_call(
        _identity_kernel,
        out_shape=jax.ShapeDtypeStruct(x.shape, x.dtype),
        in_specs=[pl.BlockSpec(memory_space=pltpu.MemorySpace.VMEM)],
        out_specs=pl.BlockSpec(memory_space=pltpu.MemorySpace.VMEM),
        input_output_aliases={0: 0},
        cost_estimate=pl.CostEstimate(
            flops=0, transcendentals=0, bytes_accessed=2 * nbytes),
        compiler_params=pltpu.CompilerParams(
            vmem_limit_bytes=_vmem_limit_bytes()),
    )(x)


def _tiled_passthrough(x):
    """Lane-dense (rows, 128) slab, 1-D grid, large tiles, ragged last block."""
    orig_shape = x.shape
    n = x.size
    itemsize = jnp.dtype(x.dtype).itemsize
    # Sublane alignment: 8 rows for 32-bit, 16 for 16-bit, 32 for 8-bit dtypes.
    sublane = max(8, 32 // itemsize)

    n_lanes = _round_up(n, LANE)
    flat = x.reshape(-1)                       # bitcast-level reshape in XLA
    padded = n_lanes != n
    if padded:
        # One extra HBM pass; skipped whenever x.size is a multiple of 128.
        flat = jnp.pad(flat, (0, n_lanes - n))
    rows = n_lanes // LANE
    slab = flat.reshape(rows, LANE)            # lane-dense: last dim = 128

    tile_rows = _select_tile_rows(itemsize, rows, sublane)
    grid = (pl.cdiv(rows, tile_rows),)         # ragged last block is fine

    out = pl.pallas_call(
        _identity_kernel,
        out_shape=jax.ShapeDtypeStruct(slab.shape, slab.dtype),
        grid=grid,
        in_specs=[pl.BlockSpec((tile_rows, LANE), lambda i: (i, 0),
                               memory_space=pltpu.MemorySpace.VMEM)],
        out_specs=pl.BlockSpec((tile_rows, LANE), lambda i: (i, 0),
                               memory_space=pltpu.MemorySpace.VMEM),
        # Reuses the input HBM buffer for the output (no second allocation).
        # NOTE: the kernel still reads N and writes N bytes; aliasing is not a
        # bandwidth fix.  Safe only while in/out index_maps match per step.
        input_output_aliases={0: 0},
        cost_estimate=pl.CostEstimate(
            flops=0, transcendentals=0,
            bytes_accessed=2 * slab.size * itemsize),
        compiler_params=pltpu.CompilerParams(
            # Shards the row grid across v7x's 2 TCs; harmless on v5e/v6e.
            # (Only matters when the grid has >=2 steps — don't shrink tiles
            #  just to feed both cores on a mem-bound copy.)
            dimension_semantics=("parallel",),
            vmem_limit_bytes=_vmem_limit_bytes(),
        ),
    )(slab)

    out_flat = out.reshape(-1)
    if padded:
        out_flat = out_flat[:n]
    return out_flat.reshape(orig_shape)


def passthrough(x):
    """Identity over x through the Pallas slot (where subclass compute goes)."""
    if x.size == 0:
        return x  # empty-input guard: nothing to do
    nbytes = x.size * jnp.dtype(x.dtype).itemsize
    if nbytes <= SMALL_BYTES:
        return _small_passthrough(x)
    return _tiled_passthrough(x)


# JIT the wrapper so any pad/reshape + kernel compile into one program and the
# aliased slab is an intermediate (true in-place donation inside the program).
passthrough_jit = jax.jit(passthrough)


class BaseModel:
    """JAX port of models.KGEModels.BaseModel (abstract base, no parameters)."""

    def __init__(self, n_entity, n_relation, args):
        self.n_entity = n_entity
        self.n_relation = n_relation
        self.embedding_size = args["embedding_size"]
        # __init__ creates no nn.Parameter / nn.Embedding -> nothing to init.

    def forward(self, x):
        # PyTorch BaseModel.forward returns None (no compute); subclasses
        # override it.  Faithfully return None.
        return None


if __name__ == "__main__":
    key = jax.random.PRNGKey(0)
    n_entity, n_relation = 100, 20
    args = {"embedding_size": 32}
    batch = 8

    model = BaseModel(n_entity, n_relation, args)

    # Deterministic example input consistent with the module's embedding_size.
    x = jax.random.normal(key, (batch, args["embedding_size"]), dtype=jnp.float32)

    # Faithful forward semantics: returns None.
    out = model.forward(x)
    assert out is None

    # Small-input fast path (single full-array block, no padding).
    y = passthrough_jit(x)
    jax.block_until_ready(y)
    assert y.shape == x.shape and y.dtype == x.dtype
    assert jnp.allclose(y, x)

    # Also exercise the tiled large-input path once (2 MiB slab, lane-dense).
    key2 = jax.random.PRNGKey(1)
    x_big = jax.random.normal(key2, (4096, 128), dtype=jnp.float32)
    y_big = passthrough_jit(x_big)
    jax.block_until_ready(y_big)
    assert y_big.shape == x_big.shape and jnp.allclose(y_big, x_big)

    print("KERNEL_OK")
</pallas_src>

<mosaic_0001>
module attributes {stable_mosaic.version = 11 : i64} {
  func.func @_identity_kernel(%arg0: memref<8x32xf32, #tpu.memory_space<vmem>>, %arg1: memref<8x32xf32, #tpu.memory_space<vmem>>) attributes {dimension_semantics = [], scalar_prefetch = 0 : i64, scratch_operands = 0 : i64, tpu.core_type = #tpu.core_type<tc>} {
    %c0 = arith.constant 0 : index
    %c0_0 = arith.constant 0 : index
    %0 = vector.load %arg0[%c0, %c0_0] : memref<8x32xf32, #tpu.memory_space<vmem>>, vector<8x32xf32>
    %c0_1 = arith.constant 0 : index
    %c0_2 = arith.constant 0 : index
    %1 = vector.load %arg1[%c0_1, %c0_2] : memref<8x32xf32, #tpu.memory_space<vmem>>, vector<8x32xf32>
    tpu.vector_store %arg1[%c0_1, %c0_2], %0 {strides = array<i32>} : memref<8x32xf32, #tpu.memory_space<vmem>>, vector<8x32xf32>,
    return
  }
}

</mosaic_0001>

<bundles_post_ra>
// kernel: passthrough.1
= control target key start
LH: loop header
LB: loop body
LE: loop exit
PB: predicated region body
PF: predicated region fallthrough
CT: control target
= control target key end

     0   :  { %6 = vsyncpa [#allocation3], 0  ;;  %s125_s0 = inlined_call_operand.hbm [shape: f32[8,32], index: 0, kind: input, shape index: {}, may-alias: {0,1}]   ;;  %s126_s1 = inlined_call_operand.hbm [shape: f32[8,32], index: 1, kind: output, shape index: {}, may-alias: {0,1}]  }
   0x1   :  { %7 = vsyncpa [#allocation4], 0  ;;  %s89_s6 = smov [#allocation2]   ;;  %s41_s10 = scalar_lea.hbm %s125_s0, 128 }
   0x2   :  { %s14_s7 = sshll.u32 %s89_s6, 4  ;;  %p42_p0 = scmp.ne.s32.totalorder %s125_s0, %s41_s10  ;;  %s15_s7 = int_to_ptr.vmem [resolvable:$true] %s14_s7 }
   0x3   :  { %p45_p1 = scmp.lt.u32.totalorder %s41_s10, %s125_s0 }
   0x5   :  { %p47_p2 = pnand %p45_p1, %p42_p0 }
   0x7   :  { %50 = shalt.err (!%p47_p2)
}
   0x8   :  { %s51_s15 = scalar_lea.vmem %s15_s7, 128  ;;  %p56_p4 = scmp.lt.s32.totalorder %s15_s7, %s15_s7 }
   0x9   :  { %p52_p3 = scmp.ne.s32.totalorder %s15_s7, %s51_s15  ;;  %p57_p5 = scmp.lt.s32.totalorder %s51_s15, %s51_s15 }
   0xb   :  { %p58_p6 = por %p57_p5, %p56_p4 }
   0xd   :  { %p59_p7 = pnand %p58_p6, %p52_p3 }
   0xf   :  { %62 = shalt.err (!%p59_p7)
}
  0x10   :  { %17 = dma.hbm_to_vmem [thread:$0]  %s125_s0, 128, %s15_s7, [#allocation3]  }
  0x11   :  { %85 = dma.done.wait [#allocation3], 128  }
  0x12   :  { %86 = vsyncadd [#allocation3], 4294967168  ;;  %s90_s18 = smov [#allocation5]   ;;  %vm22_vm0 = vcmask 261120   ;;  %v21_v0 = vld [vmem:[#allocation2] sm:$0xff] }
  0x13   :  { %s30_s19 = sshll.u32 %s90_s18, 4  ;;  %23 = vst.msk [vmem:[#allocation5] sm:$0xff] %vm22_vm0, %v21_v0  ;;  %s31_s19 = int_to_ptr.vmem [resolvable:$true] %s30_s19 }
  0x14   :  { %s63_s20 = scalar_lea.vmem %s31_s19, 128  ;;  %p68_p9 = scmp.lt.s32.totalorder %s31_s19, %s31_s19 }
  0x15   :  { %p64_p8 = scmp.ne.s32.totalorder %s31_s19, %s63_s20  ;;  %p69_p10 = scmp.lt.s32.totalorder %s63_s20, %s63_s20 }
  0x17   :  { %p70_p11 = por %p69_p10, %p68_p9 }
  0x19   :  { %p71_p12 = pnand %p70_p11, %p64_p8 }
  0x1b   :  { %74 = shalt.err (!%p71_p12)
}
  0x1c   :  { %s75_s23 = scalar_lea.hbm %s126_s1, 128 }
  0x1d   :  { %p76_p13 = scmp.ne.s32.totalorder %s126_s1, %s75_s23  ;;  %p79_p0 = scmp.lt.u32.totalorder %s75_s23, %s126_s1 }
  0x1f   :  { %p81_p1 = pnand %p79_p0, %p76_p13 }
  0x21   :  { %84 = shalt.err (!%p81_p1)
}
  0x22   :  { %33 = dma.vmem_to_hbm [thread:$0]  %s31_s19, 128, %s126_s1, [#allocation4]  }
  0x23   :  { %87 = dma.done.wait [#allocation4], 128  }
  0x24   :  { %88 = vsyncadd [#allocation4], 4294967168 }
  0x25   :  { %37 = vsyncpa [#allocation3], 1 }
  0x26   :  { %38 = vsyncpa [#allocation4], 1 }

</bundles_post_ra>
